<compile_context>
chip_gen: v7x
topology: tpu7x:2x2x1
jax: 0.10.0
libtpu: 0.0.40
codegen_flags: <defaults>
</compile_context>

<pallas_src>
import jax
import jax.numpy as jnp
from jax.experimental import pallas as pl
from jax.experimental.pallas import tpu as pltpu

REWARD_SUPPORT_SIZE = 21  # reward_support.size (synthetic choice)

IN_DIM = 34
H1_DIM = 64
H2_DIM = 32
R1_DIM = 32

PAIR = 2                   # original rows packed per kernel row (fills 128 lanes)
IN2 = PAIR * IN_DIM        # 68  : paired input width
PACK1 = 64                 # per-original-row packed width: hidden [0:32), reward [32:53)
PACK2 = PAIR * PACK1       # 128 : lane-dense kernel output width


def _round_up(x, m):
    return (x + m - 1) // m * m


def dynamics_kernel(x_ref, w1_ref, w234_ref, bias_ref, out_ref):
    x = x_ref[...].astype(jnp.float32)                 # (TM, 68); f32 compute

    b1 = bias_ref[0:1, :]                              # (1, 128) each
    b2 = bias_ref[1:2, :]
    b3 = bias_ref[2:3, :]
    b4 = bias_ref[3:4, :]

    # startBlock: Linear(34,64) -> Tanh -> Linear(64,32) -> Tanh   (x2, block-diagonal)
    h1 = jnp.tanh(jnp.dot(x, w1_ref[...], preferred_element_type=jnp.float32) + b1)
    h2 = jnp.tanh(jnp.dot(h1, w234_ref[0], preferred_element_type=jnp.float32) + b2)
    # h2: per 64-col half, cols 0:32 = hidden state, cols 32:64 = tanh(0) = 0 exactly.

    # rewardBlock: Linear(32,32) -> ReLU -> Linear(32,21), column-shifted so the reward
    # lands in cols 32:53 of each half and is exactly 0 elsewhere.
    r1 = jnp.maximum(jnp.dot(h2, w234_ref[1], preferred_element_type=jnp.float32) + b3, 0.0)
    r = jnp.dot(r1, w234_ref[2], preferred_element_type=jnp.float32) + b4

    # Packed, lane-dense (TM, 128) store — unmasked full-width vst.
    out_ref[...] = (h2 + r).astype(out_ref.dtype)


def _pack_params(params):
    """Build float32-resident, 128-wide block-diagonal weights + stacked biases."""
    f32 = jnp.float32

    def embed(w, rows, cols, r0=0, c0=0):
        w = w.astype(f32)
        return jnp.zeros((rows, cols), f32).at[r0:r0 + w.shape[0], c0:c0 + w.shape[1]].set(w)

    def blockdiag2(w):
        r, c = w.shape
        out = jnp.zeros((2 * r, 2 * c), f32)
        out = out.at[:r, :c].set(w)
        out = out.at[r:, c:].set(w)
        return out

    w1p = embed(params["w1"], IN_DIM, PACK1)                      # (34, 64)
    w2p = embed(params["w2"], H1_DIM, PACK1)                      # (64, 64), cols 0:32
    w3p = embed(params["w3"], PACK1, PACK1)                       # (64, 64), rows/cols 0:32
    w4p = embed(params["w4"], PACK1, PACK1, c0=H2_DIM)            # rows 0:32, cols 32:53

    w1 = blockdiag2(w1p)                                          # (68, 128)
    w234 = jnp.stack([blockdiag2(w2p), blockdiag2(w3p), blockdiag2(w4p)])  # (3,128,128)

    def bias_row(b, c0=0):
        b = b.astype(f32).reshape(1, -1)
        row = jnp.zeros((1, PACK1), f32).at[:, c0:c0 + b.shape[1]].set(b)
        return jnp.tile(row, (1, PAIR))                           # (1, 128)

    bias = jnp.concatenate([
        bias_row(params["b1"]),
        bias_row(params["b2"]),
        bias_row(params["b3"]),
        bias_row(params["b4"], c0=H2_DIM),
    ], axis=0)                                                    # (4, 128)
    return w1, w234, bias


def _choose_tiling(rows, tile_m):
    """rows = paired rows. Returns (tm, rows_pad, n_tiles); tm is a multiple of 32."""
    tile_m = max(32, int(tile_m))
    n_tiles = max(1, pl.cdiv(rows, tile_m))
    if rows >= 64:
        n_tiles = max(n_tiles, 2)     # v7x: give the "parallel" axis >= 2 steps (both TCs)
        if n_tiles % 2:
            n_tiles += 1              # keep the two cores balanced
    tm = _round_up(pl.cdiv(rows, n_tiles), 32)
    rows_pad = tm * n_tiles
    return tm, rows_pad, n_tiles


def dynamics_forward(x, params, *, io_dtype=None, tile_m=4096):
    """x: (B, 34). Returns (hidden (B, 32), reward (B, 21)) in io_dtype.

    io_dtype applies only to the streamed x / packed-output HBM traffic (default:
    x.dtype). Weights stay float32-resident and all matmuls accumulate in float32;
    pass io_dtype=jnp.bfloat16 to halve HBM traffic at large B.
    """
    B = x.shape[0]
    io_dtype = jnp.dtype(x.dtype if io_dtype is None else io_dtype)
    w1, w234, bias = _pack_params(params)

    rows = (B + PAIR - 1) // PAIR                 # paired rows actually needed
    tm, rows_pad, n_tiles = _choose_tiling(rows, tile_m)
    total_rows = PAIR * rows_pad

    x_io = x.astype(io_dtype)
    if total_rows != B:
        x_io = jnp.pad(x_io, ((0, total_rows - B), (0, 0)))
    x2 = x_io.reshape(rows_pad, IN2)              # contiguous row-pair reshape (free)

    io_itemsize = jnp.dtype(io_dtype).itemsize
    weight_bytes = 4 * int(w1.size + w234.size + bias.size)       # f32 resident
    flops_per_prow = 2 * (IN2 * PACK2 + 3 * PACK2 * PACK2)
    cost = pl.CostEstimate(
        flops=int(rows_pad * flops_per_prow),
        transcendentals=int(rows_pad * 2 * PACK2),                # two tanh layers, 128 lanes
        bytes_accessed=int(rows_pad * (IN2 + PACK2) * io_itemsize + weight_bytes),
    )

    # Scoped-VMEM budget: x block (68 cols, lane-padded to 128) + out block (128 cols),
    # double-buffered, plus double-buffered f32 weights. Raise above v5e's 16 MiB default
    # when the tile needs it; never request past v7x's 64 MiB physical VMEM.
    block_bytes = 2 * 2 * tm * 128 * io_itemsize
    vmem_need = block_bytes + 2 * weight_bytes + (2 << 20)
    vmem_limit = int(min(max(vmem_need, 32 * 1024 * 1024), 64 * 1024 * 1024))

    packed2 = pl.pallas_call(
        dynamics_kernel,
        out_shape=jax.ShapeDtypeStruct((rows_pad, PACK2), io_dtype),
        grid=(n_tiles,),
        in_specs=[
            pl.BlockSpec((tm, IN2), lambda i: (i, 0)),            # x: pipelined over batch
            pl.BlockSpec(w1.shape, lambda i: (0, 0)),             # VMEM-resident weights
            pl.BlockSpec(w234.shape, lambda i: (0, 0, 0)),
            pl.BlockSpec(bias.shape, lambda i: (0, 0)),
        ],
        out_specs=pl.BlockSpec((tm, PACK2), lambda i: (i, 0)),
        compiler_params=pltpu.CompilerParams(
            dimension_semantics=("parallel",),                    # v7x: shard batch over 2 TCs
            vmem_limit_bytes=vmem_limit),
        cost_estimate=cost,
    )(x2, w1, w234, bias)

    packed = packed2[:rows].reshape(rows * PAIR, PACK1)[:B]       # (B, 64)
    hidden = packed[:, :H2_DIM]
    reward = packed[:, H2_DIM:H2_DIM + REWARD_SUPPORT_SIZE]
    return hidden, reward


def init_params(key):
    """Deterministic synthetic parameters (shapes from the module __init__)."""
    ks = jax.random.split(key, 8)

    def linear(kw, kb, fan_in, fan_out):
        lim = 1.0 / jnp.sqrt(jnp.float32(fan_in))
        w = jax.random.uniform(kw, (fan_in, fan_out), jnp.float32, -lim, lim)
        b = jax.random.uniform(kb, (1, fan_out), jnp.float32, -lim, lim)
        return w, b

    w1, b1 = linear(ks[0], ks[1], IN_DIM, H1_DIM)
    w2, b2 = linear(ks[2], ks[3], H1_DIM, H2_DIM)
    w3, b3 = linear(ks[4], ks[5], H2_DIM, R1_DIM)
    w4, b4 = linear(ks[6], ks[7], R1_DIM, REWARD_SUPPORT_SIZE)
    return dict(w1=w1, b1=b1, w2=w2, b2=b2, w3=w3, b3=b3, w4=w4, b4=b4)


def reference_forward(x, p):
    h1 = jnp.tanh(x @ p["w1"] + p["b1"])
    h2 = jnp.tanh(h1 @ p["w2"] + p["b2"])
    r1 = jnp.maximum(h2 @ p["w3"] + p["b3"], 0.0)
    r = r1 @ p["w4"] + p["b4"]
    return h2, r


if __name__ == "__main__":
    key = jax.random.PRNGKey(0)
    k_param, k_x = jax.random.split(key)

    B = 8
    x = jax.random.normal(k_x, (B, IN_DIM), jnp.float32)
    params = init_params(k_param)
    h_ref, r_ref = reference_forward(x, params)

    # float32 I/O path (exact module semantics).
    hidden, reward = dynamics_forward(x, params)
    hidden, reward = jax.block_until_ready((hidden, reward))
    assert hidden.shape == (B, H2_DIM)
    assert reward.shape == (B, REWARD_SUPPORT_SIZE)
    assert jnp.allclose(hidden, h_ref, atol=1e-4), "hidden mismatch (f32)"
    assert jnp.allclose(reward, r_ref, atol=1e-4), "reward mismatch (f32)"

    # Odd batch (exercises row-pair + tile padding path).
    B_odd = 5
    h_odd, r_odd = jax.block_until_ready(dynamics_forward(x[:B_odd], params))
    assert h_odd.shape == (B_odd, H2_DIM) and r_odd.shape == (B_odd, REWARD_SUPPORT_SIZE)
    assert jnp.allclose(h_odd, h_ref[:B_odd], atol=1e-4), "hidden mismatch (odd B)"
    assert jnp.allclose(r_odd, r_ref[:B_odd], atol=1e-4), "reward mismatch (odd B)"

    # bfloat16 HBM-I/O path (f32-resident weights, f32 accumulation) — looser tolerance.
    hidden_bf, reward_bf = dynamics_forward(x, params, io_dtype=jnp.bfloat16)
    hidden_bf, reward_bf = jax.block_until_ready((hidden_bf, reward_bf))
    assert hidden_bf.shape == (B, H2_DIM)
    assert reward_bf.shape == (B, REWARD_SUPPORT_SIZE)
    assert jnp.allclose(hidden_bf.astype(jnp.float32), h_ref, atol=1e-1), "hidden mismatch (bf16)"
    assert jnp.allclose(reward_bf.astype(jnp.float32), r_ref, atol=1e-1), "reward mismatch (bf16)"

    print("KERNEL_OK")
</pallas_src>

<mosaic_0001>
module attributes {stable_mosaic.version = 11 : i64} {
  func.func @dynamics_kernel(%arg0: i32, %arg1: memref<32x68xf32, #tpu.memory_space<vmem>>, %arg2: memref<68x128xf32, #tpu.memory_space<vmem>>, %arg3: memref<3x128x128xf32, #tpu.memory_space<vmem>>, %arg4: memref<4x128xf32, #tpu.memory_space<vmem>>, %arg5: memref<32x128xf32, #tpu.memory_space<vmem>>) attributes {dimension_semantics = [#tpu.dimension_semantics<parallel>], iteration_bounds = array<i64: 1>, scalar_prefetch = 0 : i64, scratch_operands = 0 : i64, tpu.core_type = #tpu.core_type<tc>, window_params = [{transform_indices = @transform_0, window_bounds = array<i64: 32, 68>}, {pipeline_mode = #tpu.pipeline_mode<synchronous>, transform_indices = @transform_1, window_bounds = array<i64: 68, 128>}, {pipeline_mode = #tpu.pipeline_mode<synchronous>, transform_indices = @transform_2, window_bounds = array<i64: 3, 128, 128>}, {pipeline_mode = #tpu.pipeline_mode<synchronous>, transform_indices = @transform_3, window_bounds = array<i64: 4, 128>}, {transform_indices = @transform_4, window_bounds = array<i64: 32, 128>}]} {
    %c0 = arith.constant 0 : index
    %c0_0 = arith.constant 0 : index
    %0 = vector.load %arg1[%c0, %c0_0] : memref<32x68xf32, #tpu.memory_space<vmem>>, vector<32x68xf32>
    %c0_1 = arith.constant 0 : index
    %c0_2 = arith.constant 0 : index
    %1 = vector.load %arg4[%c0_1, %c0_2] : memref<4x128xf32, #tpu.memory_space<vmem>>, vector<1x128xf32>
    %c1 = arith.constant 1 : index
    %c0_3 = arith.constant 0 : index
    %2 = vector.load %arg4[%c1, %c0_3] : memref<4x128xf32, #tpu.memory_space<vmem>>, vector<1x128xf32>
    %c2 = arith.constant 2 : index
    %c0_4 = arith.constant 0 : index
    %3 = vector.load %arg4[%c2, %c0_4] : memref<4x128xf32, #tpu.memory_space<vmem>>, vector<1x128xf32>
    %c3 = arith.constant 3 : index
    %c0_5 = arith.constant 0 : index
    %4 = vector.load %arg4[%c3, %c0_5] : memref<4x128xf32, #tpu.memory_space<vmem>>, vector<1x128xf32>
    %c0_6 = arith.constant 0 : index
    %c0_7 = arith.constant 0 : index
    %5 = vector.load %arg2[%c0_6, %c0_7] : memref<68x128xf32, #tpu.memory_space<vmem>>, vector<68x128xf32>
    %cst = arith.constant dense<0.000000e+00> : vector<32x128xf32>
    %6 = tpu.matmul %0, %5, %cst {dimension_numbers = #tpu.dot_dimension_numbers<[1], [0], [0], [1], [0, 0, 1, 1], [], []>} : vector<32x68xf32>, vector<68x128xf32>, vector<32x128xf32> -> vector<32x128xf32>
    %7 = vector.broadcast %1 : vector<1x128xf32> to vector<32x128xf32>
    %8 = arith.addf %6, %7 : vector<32x128xf32>
    %9 = math.tanh %8 : vector<32x128xf32>
    %c0_8 = arith.constant 0 : index
    %c0_9 = arith.constant 0 : index
    %c0_10 = arith.constant 0 : index
    %10 = vector.load %arg3[%c0_8, %c0_9, %c0_10] : memref<3x128x128xf32, #tpu.memory_space<vmem>>, vector<1x128x128xf32>
    %11 = vector.shape_cast %10 : vector<1x128x128xf32> to vector<128x128xf32>
    %cst_11 = arith.constant dense<0.000000e+00> : vector<32x128xf32>
    %12 = tpu.matmul %9, %11, %cst_11 {dimension_numbers = #tpu.dot_dimension_numbers<[1], [0], [0], [1], [0, 0, 1, 1], [], []>} : vector<32x128xf32>, vector<128x128xf32>, vector<32x128xf32> -> vector<32x128xf32>
    %13 = vector.broadcast %2 : vector<1x128xf32> to vector<32x128xf32>
    %14 = arith.addf %12, %13 : vector<32x128xf32>
    %15 = math.tanh %14 : vector<32x128xf32>
    %c1_12 = arith.constant 1 : index
    %c0_13 = arith.constant 0 : index
    %c0_14 = arith.constant 0 : index
    %16 = vector.load %arg3[%c1_12, %c0_13, %c0_14] : memref<3x128x128xf32, #tpu.memory_space<vmem>>, vector<1x128x128xf32>
    %17 = vector.shape_cast %16 : vector<1x128x128xf32> to vector<128x128xf32>
    %cst_15 = arith.constant dense<0.000000e+00> : vector<32x128xf32>
    %18 = tpu.matmul %15, %17, %cst_15 {dimension_numbers = #tpu.dot_dimension_numbers<[1], [0], [0], [1], [0, 0, 1, 1], [], []>} : vector<32x128xf32>, vector<128x128xf32>, vector<32x128xf32> -> vector<32x128xf32>
    %19 = vector.broadcast %3 : vector<1x128xf32> to vector<32x128xf32>
    %20 = arith.addf %18, %19 : vector<32x128xf32>
    %cst_16 = arith.constant 0.000000e+00 : f32
    %21 = vector.broadcast %cst_16 : f32 to vector<32x128xf32>
    %22 = arith.maximumf %20, %21 : vector<32x128xf32>
    %c2_17 = arith.constant 2 : index
    %c0_18 = arith.constant 0 : index
    %c0_19 = arith.constant 0 : index
    %23 = vector.load %arg3[%c2_17, %c0_18, %c0_19] : memref<3x128x128xf32, #tpu.memory_space<vmem>>, vector<1x128x128xf32>
    %24 = vector.shape_cast %23 : vector<1x128x128xf32> to vector<128x128xf32>
    %cst_20 = arith.constant dense<0.000000e+00> : vector<32x128xf32>
    %25 = tpu.matmul %22, %24, %cst_20 {dimension_numbers = #tpu.dot_dimension_numbers<[1], [0], [0], [1], [0, 0, 1, 1], [], []>} : vector<32x128xf32>, vector<128x128xf32>, vector<32x128xf32> -> vector<32x128xf32>
    %26 = vector.broadcast %4 : vector<1x128xf32> to vector<32x128xf32>
    %27 = arith.addf %25, %26 : vector<32x128xf32>
    %28 = arith.addf %15, %27 : vector<32x128xf32>
    %c0_21 = arith.constant 0 : index
    %c0_22 = arith.constant 0 : index
    %29 = vector.load %arg5[%c0_21, %c0_22] : memref<32x128xf32, #tpu.memory_space<vmem>>, vector<32x128xf32>
    tpu.vector_store %arg5[%c0_21, %c0_22], %28 {strides = array<i32>} : memref<32x128xf32, #tpu.memory_space<vmem>>, vector<32x128xf32>,
    return
  }
  func.func @transform_0(%arg0: i32) -> (i32, i32) {
    %c0_i32 = arith.constant 0 : i32
    %c0_i32_0 = arith.constant 0 : i32
    return %arg0, %c0_i32 : i32, i32
  }
  func.func @transform_1(%arg0: i32) -> (i32, i32) {
    %c0_i32 = arith.constant 0 : i32
    %c0_i32_0 = arith.constant 0 : i32
    %c0_i32_1 = arith.constant 0 : i32
    return %c0_i32, %c0_i32_0 : i32, i32
  }
  func.func @transform_2(%arg0: i32) -> (i32, i32, i32) {
    %c0_i32 = arith.constant 0 : i32
    %c0_i32_0 = arith.constant 0 : i32
    %c0_i32_1 = arith.constant 0 : i32
    %c0_i32_2 = arith.constant 0 : i32
    return %c0_i32, %c0_i32_0, %c0_i32_1 : i32, i32, i32
  }
  func.func @transform_3(%arg0: i32) -> (i32, i32) {
    %c0_i32 = arith.constant 0 : i32
    %c0_i32_0 = arith.constant 0 : i32
    %c0_i32_1 = arith.constant 0 : i32
    return %c0_i32, %c0_i32_0 : i32, i32
  }
  func.func @transform_4(%arg0: i32) -> (i32, i32) {
    %c0_i32 = arith.constant 0 : i32
    %c0_i32_0 = arith.constant 0 : i32
    return %arg0, %c0_i32 : i32, i32
  }
}

</mosaic_0001>

<bundles_post_ra>
// kernel: tpu_custom_call.1
= control target key start
LH: loop header
LB: loop body
LE: loop exit
PB: predicated region body
PF: predicated region fallthrough
CT: control target
= control target key end

     0   :  { %9 = vsyncpa [#allocation3], 0  ;;  %s1099_s0 = inlined_call_operand.hbm [shape: f32[32,68], index: 0, kind: input, shape index: {}]   ;;  %s1100_s1 = inlined_call_operand.hbm [shape: f32[68,128], index: 1, kind: input, shape index: {}]   ;;  %s1101_s2 = inlined_call_operand.hbm [shape: f32[3,128,128], index: 2, kind: input, shape index: {}]   ;;  %s1102_s3 = inlined_call_operand.vmem [shape: f32[4,128], index: 3, kind: input, shape index: {}]   ;;  %s1103_s4 = inlined_call_operand.hbm [shape: f32[32,128], index: 4, kind: output, shape index: {}]  }
   0x1   :  { %10 = vsyncpa [#allocation6], 0 }
   0x2   :  { %11 = vsyncpa [#allocation4], 0  ;;  %s985_s15 = smov [#allocation5]   ;;  %s986_s17 = smov [#allocation2]  }
   0x3   :  { %s29_s16 = sshll.u32 %s985_s15, 4  ;;  %s17_s18 = sshll.u32 %s986_s17, 4  ;;  %s30_s16 = int_to_ptr.vmem [resolvable:$true] %s29_s16  ;;  %s1016_s18 = int_to_ptr.vmem [resolvable:$true] %s17_s18 }
   0x4   :  { %s891_s21 = scalar_lea.hbm %s1100_s1, 1152 }
   0x5   :  { %p892_p0 = scmp.ne.s32.totalorder %s1100_s1, %s891_s21  ;;  %p895_p1 = scmp.lt.u32.totalorder %s891_s21, %s1100_s1 }
   0x7   :  { %p897_p2 = pnand %p895_p1, %p892_p0 }
   0x9   :  { %900 = shalt.err (!%p897_p2)
}
   0xa   :  { %s901_s26 = scalar_lea.vmem %s30_s16, 1152  ;;  %p906_p4 = scmp.lt.s32.totalorder %s30_s16, %s30_s16 }
   0xb   :  { %p902_p3 = scmp.ne.s32.totalorder %s30_s16, %s901_s26  ;;  %p907_p5 = scmp.lt.s32.totalorder %s901_s26, %s901_s26 }
   0xd   :  { %p908_p6 = por %p907_p5, %p906_p4 }
   0xf   :  { %p909_p7 = pnand %p908_p6, %p902_p3 }
  0x11   :  { %912 = shalt.err (!%p909_p7)
}
  0x12   :  { %s987_s27 = smov 128   ;;  %s988_s28 = smov 8  }
  0x13   :  { %35 = dma.hbm_to_vmem [thread:$0]  %s1100_s1, 1152, %s30_s16, [#allocation6], %s987_s27, %s987_s27, %s988_s28  }
  0x14   :  { %s913_s7 = scalar_lea.hbm %s1099_s0, 512 }
  0x15   :  { %p914_p8 = scmp.ne.s32.totalorder %s1099_s0, %s913_s7  ;;  %p917_p9 = scmp.lt.u32.totalorder %s913_s7, %s1099_s0 }
  0x17   :  { %p919_p10 = pnand %p917_p9, %p914_p8 }
  0x19   :  { %922 = shalt.err (!%p919_p10)
}
  0x1a   :  { %s923_s12 = scalar_lea.vmem %s1016_s18, 512  ;;  %p928_p12 = scmp.lt.s32.totalorder %s1016_s18, %s1016_s18 }
  0x1b   :  { %p924_p11 = scmp.ne.s32.totalorder %s1016_s18, %s923_s12  ;;  %p929_p13 = scmp.lt.s32.totalorder %s923_s12, %s923_s12 }
  0x1d   :  { %p930_p0 = por %p929_p13, %p928_p12 }
  0x1f   :  { %p931_p1 = pnand %p930_p0, %p924_p11 }
  0x21   :  { %934 = shalt.err (!%p931_p1)
}
  0x22   :  { %23 = dma.hbm_to_vmem [thread:$0]  %s1099_s0, 512, %s1016_s18, [#allocation3], %s987_s27, %s987_s27, %s988_s28  }
  0x23   :  { %s989_s14 = smov [#allocation7]   ;;  %s935_s19 = scalar_lea.hbm %s1101_s2, 6144 }
  0x24   :  { %s41_s15 = sshll.u32 %s989_s14, 4  ;;  %p936_p2 = scmp.ne.s32.totalorder %s1101_s2, %s935_s19  ;;  %s42_s15 = int_to_ptr.vmem [resolvable:$true] %s41_s15 }
  0x25   :  { %p939_p3 = scmp.lt.u32.totalorder %s935_s19, %s1101_s2 }
  0x27   :  { %p941_p4 = pnand %p939_p3, %p936_p2 }
  0x29   :  { %944 = shalt.err (!%p941_p4)
}
  0x2a   :  { %s945_s24 = scalar_lea.vmem %s42_s15, 6144  ;;  %p950_p6 = scmp.lt.s32.totalorder %s42_s15, %s42_s15 }
  0x2b   :  { %p946_p5 = scmp.ne.s32.totalorder %s42_s15, %s945_s24  ;;  %p951_p7 = scmp.lt.s32.totalorder %s945_s24, %s945_s24 }
  0x2d   :  { %p952_p8 = por %p951_p7, %p950_p6 }
  0x2f   :  { %p953_p9 = pnand %p952_p8, %p946_p5 }
  0x31   :  { %956 = shalt.err (!%p953_p9)
}
  0x32   :  { %47 = dma.hbm_to_vmem [thread:$0]  %s1101_s2, 6144, %s42_s15, [#allocation6], %s987_s27, %s987_s27, %s988_s28  }
  0x33   :  { %979 = dma.done.wait [#allocation3], 512  }
  0x34   :  { %980 = vsyncadd [#allocation3], 4294966784 }
  0x35   :  { %981 = dma.done.wait [#allocation6], 7296  }
  0x36   :  { %982 = vsyncadd [#allocation6], 4294960000  ;;  %v67_v0 = vld [vmem:[#allocation5] sm:$0xff]  ;;  %v68_v1 = vld [vmem:[#allocation5 + $0x8] sm:$0xff]  ;;  %vm80_vm0 = vcmask 556032   ;;  %vm93_vm1 = vcmask 1043456  }
  0x37   :  { %v69_v2 = vld [vmem:[#allocation5 + $0x10] sm:$0xff]  ;;  %v757_v3 = vpack.c.bf16 %v68_v1, %v67_v0  ;;  %v70_v4 = vld [vmem:[#allocation5 + $0x18] sm:$0xff]  ;;  %v71_v6 = vld [vmem:[#allocation5 + $0x20] sm:$0xff]  ;;  %s990_s8 = smov [#allocation8]  }
  0x38   :  { %v761_v5 = vpack.c.bf16 %v70_v4, %v69_v2  ;;  %v72_v7 = vld [vmem:[#allocation5 + $0x28] sm:$0xff]  ;;  %v59_v8 = vld [vmem:[#allocation2] sm:$0xff]  ;;  %v187_v10 = vld [vmem:[#allocation7 + $0x8] sm:$0xff]  ;;  %s524_s9 = sshll.u32 %s990_s8, 4  ;;  %s525_s9 = int_to_ptr.vmem [resolvable:$true] %s524_s9 }
  0x39   :  { %758 = vmatprep.subr.bf16.mxu0 %v757_v3  ;;  %637 = vmatprep.mubr.msk.f32.mxu0 %vm80_vm0, %v59_v8  ;;  %v186_v9 = vld [vmem:[#allocation7] sm:$0xff]  ;;  %v765_v11 = vpack.c.bf16 %v72_v7, %v71_v6  ;;  %v73_v12 = vld [vmem:[#allocation5 + $0x30] sm:$0xff]  ;;  %v188_v14 = vld [vmem:[#allocation7 + $0x10] sm:$0xff]  ;;  %p962_p11 = scmp.lt.s32.totalorder %s525_s9, %s525_s9 }
  0x3a   :  { %760 = vmatpush3.bf16.msra.mxu0 %v757_v3  ;;  %v773_v13 = vpack.c.bf16 %v187_v10, %v186_v9  ;;  %v189_v15 = vld [vmem:[#allocation7 + $0x18] sm:$0xff]  ;;  %v74_v16 = vld [vmem:[#allocation5 + $0x38] sm:$0xff]  ;;  %v190_v18 = vld [vmem:[#allocation7 + $0x20] sm:$0xff] }
  0x3b   :  { %762 = vmatprep.subr.bf16.mxu0 %v761_v5  ;;  %v777_v17 = vpack.c.bf16 %v189_v15, %v188_v14  ;;  %v191_v19 = vld [vmem:[#allocation7 + $0x28] sm:$0xff]  ;;  %v769_v20 = vpack.c.bf16 %v74_v16, %v73_v12  ;;  %v192_v22 = vld [vmem:[#allocation7 + $0x30] sm:$0xff]  ;;  %v193_v23 = vld [vmem:[#allocation7 + $0x38] sm:$0xff] }
  0x3c   :  { %774 = vmatprep.subr.bf16.mxu1 %v773_v13  ;;  %v781_v21 = vpack.c.bf16 %v191_v19, %v190_v18  ;;  %v785_v24 = vpack.c.bf16 %v193_v23, %v192_v22  ;;  %v75_v25 = vld [vmem:[#allocation5 + $0x40] sm:$0xf]  ;;  %v60_v26 = vld [vmem:[#allocation2 + $0x8] sm:$0xff]  ;;  %v61_v27 = vld [vmem:[#allocation2 + $0x10] sm:$0xff] }
  0x3d   :  { %776 = vmatpush3.bf16.msra.mxu1 %v773_v13  ;;  %v62_v28 = vld [vmem:[#allocation2 + $0x18] sm:$0xff]  ;;  %v194_v29 = vld [vmem:[#allocation7 + $0x40] sm:$0xff]  ;;  %v195_v30 = vld [vmem:[#allocation7 + $0x48] sm:$0xff] }
  0x3e   :  { %764 = vmatpush3.bf16.msra.mxu0 %v761_v5  ;;  %778 = vmatprep.subr.bf16.mxu1 %v777_v17  ;;  %v789_v31 = vpack.c.bf16 %v195_v30, %v194_v29  ;;  %v196_v32 = vld [vmem:[#allocation7 + $0x50] sm:$0xff]  ;;  %v197_v33 = vld [vmem:[#allocation7 + $0x58] sm:$0xff]  ;;  %v198_v35 = vld [vmem:[#allocation7 + $0x60] sm:$0xff] }
  0x3f   :  { %766 = vmatprep.subr.bf16.mxu0 %v765_v11  ;;  %v793_v34 = vpack.c.bf16 %v197_v33, %v196_v32  ;;  %v199_v36 = vld [vmem:[#allocation7 + $0x68] sm:$0xff]  ;;  %v200_v38 = vld [vmem:[#allocation7 + $0x70] sm:$0xff]  ;;  %v201_v39 = vld [vmem:[#allocation7 + $0x78] sm:$0xff] }
  0x40   :  { %v797_v37 = vpack.c.bf16 %v199_v36, %v198_v35  ;;  %v801_v40 = vpack.c.bf16 %v201_v39, %v200_v38  ;;  %v296_v41 = vld [vmem:[#allocation7 + $0x80] sm:$0xff]  ;;  %v297_v42 = vld [vmem:[#allocation7 + $0x88] sm:$0xff]  ;;  %v298_v43 = vld [vmem:[#allocation7 + $0x90] sm:$0xff] }
  0x41   :  { %780 = vmatpush3.bf16.msra.mxu1 %v777_v17  ;;  %v805_v44 = vpack.c.bf16 %v297_v42, %v296_v41  ;;  %v299_v45 = vld [vmem:[#allocation7 + $0x98] sm:$0xff]  ;;  %v300_v47 = vld [vmem:[#allocation7 + $0xa0] sm:$0xff]  ;;  %v301_v48 = vld [vmem:[#allocation7 + $0xa8] sm:$0xff] }
  0x42   :  { %768 = vmatpush3.bf16.msra.mxu0 %v765_v11  ;;  %782 = vmatprep.subr.bf16.mxu1 %v781_v21  ;;  %v809_v46 = vpack.c.bf16 %v299_v45, %v298_v43  ;;  %v813_v49 = vpack.c.bf16 %v301_v48, %v300_v47  ;;  %v302_v50 = vld [vmem:[#allocation7 + $0xb0] sm:$0xff]  ;;  %v303_v51 = vld [vmem:[#allocation7 + $0xb8] sm:$0xff]  ;;  %v304_v2 = vld [vmem:[#allocation7 + $0xc0] sm:$0xff] }
  0x43   :  { %770 = vmatprep.subr.bf16.mxu0 %v769_v20  ;;  %v817_v52 = vpack.c.bf16 %v303_v51, %v302_v50  ;;  %v537_v53 = vld [vmem:[%s1102_s3] ss:$0 sm:$0xff]  ;;  %v305_v3 = vld [vmem:[#allocation7 + $0xc8] sm:$0xff]  ;;  %v306_v5 = vld [vmem:[#allocation7 + $0xd0] sm:$0xff] }
  0x44   :  { %v821_v4 = vpack.c.bf16 %v305_v3, %v304_v2  ;;  %v307_v6 = vld [vmem:[#allocation7 + $0xd8] sm:$0xff]  ;;  %v308_v8 = vld [vmem:[#allocation7 + $0xe0] sm:$0xff]  ;;  %v309_v9 = vld [vmem:[#allocation7 + $0xe8] sm:$0xff] }
  0x45   :  { %784 = vmatpush3.bf16.msra.mxu1 %v781_v21  ;;  %v825_v7 = vpack.c.bf16 %v307_v6, %v306_v5  ;;  %v829_v10 = vpack.c.bf16 %v309_v9, %v308_v8  ;;  %v310_v11 = vld [vmem:[#allocation7 + $0xf0] sm:$0xff]  ;;  %v311_v12 = vld [vmem:[#allocation7 + $0xf8] sm:$0xff]  ;;  %v406_v14 = vld [vmem:[#allocation7 + $0x100] sm:$0xff] }
  0x46   :  { %772 = vmatpush3.bf16.msra.mxu0 %v769_v20  ;;  %786 = vmatprep.subr.bf16.mxu1 %v785_v24  ;;  %v833_v13 = vpack.c.bf16 %v311_v12, %v310_v11  ;;  %v407_v15 = vld [vmem:[#allocation7 + $0x108] sm:$0xff]  ;;  %v408_v16 = vld [vmem:[#allocation7 + $0x110] sm:$0xff]  ;;  %v409_v18 = vld [vmem:[#allocation7 + $0x118] sm:$0xff] }
  0x47   :  { %635 = vmatprep.subr.msk.mxu0 %vm93_vm1, %v75_v25  ;;  %v837_v17 = vpack.c.bf16 %v407_v15, %v406_v14  ;;  %v841_v19 = vpack.c.bf16 %v409_v18, %v408_v16  ;;  %v410_v20 = vld [vmem:[#allocation7 + $0x120] sm:$0xff]  ;;  %v411_v21 = vld [vmem:[#allocation7 + $0x128] sm:$0xff]  ;;  %v412_v23 = vld [vmem:[#allocation7 + $0x130] sm:$0xff] }
  0x48   :  { %v845_v22 = vpack.c.bf16 %v411_v21, %v410_v20  ;;  %v416_v29 = vld [vmem:[#allocation7 + $0x150] sm:$0xff]  ;;  %v417_v30 = vld [vmem:[#allocation7 + $0x158] sm:$0xff]  ;;  %v418_v32 = vld [vmem:[#allocation7 + $0x160] sm:$0xff] }
  0x49   :  { %788 = vmatpush3.bf16.msra.mxu1 %v785_v24  ;;  %v413_v24 = vld [vmem:[#allocation7 + $0x138] sm:$0xff]  ;;  %v419_v33 = vld [vmem:[#allocation7 + $0x168] sm:$0xff]  ;;  %v420_v48 = vld [vmem:[#allocation7 + $0x170] sm:$0xff] }
  0x4a   :  { %636 = vmatpush3.msk.msra.mxu0 %vm93_vm1, %v75_v25  ;;  %790 = vmatprep.subr.bf16.mxu1 %v789_v31  ;;  %v849_v25 = vpack.c.bf16 %v413_v24, %v412_v23  ;;  %v543_v35 = vld [vmem:[%s1102_s3 + $0x1] ss:$0 sm:$0xff]  ;;  %v544_v51 = vld [vmem:[%s1102_s3 + $0x2] ss:$0 sm:$0xff] }
  0x4b   :  { %638 = vmatmul.mubr.msk.f32.vlgmr.msra.gmra.mrb[0].mxu0 %vm80_vm0, %v60_v26  ;;  %806 = vmatprep.subr.bf16.mxu0 %v805_v44  ;;  %v414_v26 = vld [vmem:[#allocation7 + $0x140] sm:$0xff] }
  0x4c   :  { %640 = vmatprep.mubr.msk.f32.mxu0 %vm80_vm0, %v61_v27  ;;  %808 = vmatpush3.bf16.msra.mxu0 %v805_v44  ;;  %v415_v27 = vld [vmem:[#allocation7 + $0x148] sm:$0xff] }
  0x4d   :  { %792 = vmatpush3.bf16.msra.mxu1 %v789_v31  ;;  %810 = vmatprep.subr.bf16.mxu0 %v809_v46  ;;  %v857_v31 = vpack.c.bf16 %v417_v30, %v416_v29 }
  0x4e   :  { %794 = vmatprep.subr.bf16.mxu1 %v793_v34 }
  0x4f   :  { %641 = vmatmul.mubr.msk.f32.gmra.mrb[2].mxu0 %vm80_vm0, %v62_v28  ;;  %v853_v28 = vpack.c.bf16 %v415_v27, %v414_v26 }
  0x50   :  { %812 = vmatpush3.bf16.msra.mxu0 %v809_v46 }
  0x51   :  { %796 = vmatpush3.bf16.msra.mxu1 %v793_v34  ;;  %814 = vmatprep.subr.bf16.mxu0 %v813_v49  ;;  %v861_v34 = vpack.c.bf16 %v419_v33, %v418_v32 }
  0x52   :  { %798 = vmatprep.subr.bf16.mxu1 %v797_v37 }
  0x54   :  { %816 = vmatpush3.bf16.msra.mxu0 %v813_v49  ;;  %v421_v49 = vld [vmem:[#allocation7 + $0x178] sm:$0xff] }
  0x55   :  { %800 = vmatpush3.bf16.msra.mxu1 %v797_v37  ;;  %818 = vmatprep.subr.bf16.mxu0 %v817_v52  ;;  %v865_v50 = vpack.c.bf16 %v421_v49, %v420_v48 }
  0x56   :  { %802 = vmatprep.subr.bf16.mxu1 %v801_v40 }
  0x58   :  { %820 = vmatpush3.bf16.msra.mxu0 %v817_v52 }
  0x59   :  { %804 = vmatpush3.bf16.msra.mxu1 %v801_v40  ;;  %822 = vmatprep.subr.bf16.mxu0 %v821_v4 }
  0x5a   :  { %838 = vmatprep.subr.bf16.mxu1 %v837_v17 }
  0x5c   :  { %824 = vmatpush3.bf16.msra.mxu0 %v821_v4 }
  0x5d   :  { %826 = vmatprep.subr.bf16.mxu0 %v825_v7 }
  0x60   :  { %828 = vmatpush3.bf16.msra.mxu0 %v825_v7 }
  0x61   :  { %830 = vmatprep.subr.bf16.mxu0 %v829_v10 }
  0x64   :  { %832 = vmatpush3.bf16.msra.mxu0 %v829_v10 }
  0x65   :  { %834 = vmatprep.subr.bf16.mxu0 %v833_v13 }
  0x68   :  { %836 = vmatpush3.bf16.msra.mxu0 %v833_v13 }
 0x11e   :  { %v639_v54 = vpop.f32.mrb[0].mxu0 }
 0x11f   :  { %v169_v55 = vadd.f32 %v639_v54, %v537_v53  ;;  %v163_v56 = vpop.f32.mrb[1].mxu0 }
 0x120   :  { %v164_v57 = vadd.f32 %v537_v53, %v163_v56 }
 0x122   :  { %875 = vtanh.f32 %v164_v57  ;;  %v642_v58 = vpop.f32.mrb[2].mxu0 }
 0x123   :  { %877 = vtanh.f32 %v169_v55  ;;  %v179_v59 = vadd.f32 %v642_v58, %v537_v53  ;;  %v173_v60 = vpop.f32.mrb[3].mxu0 }
 0x124   :  { %v174_v61 = vadd.f32 %v537_v53, %v173_v60 }
 0x126   :  { %879 = vtanh.f32 %v174_v61 }
 0x127   :  { %881 = vtanh.f32 %v179_v59 }
 0x12c   :  { %v876_v62 = vpop.eup %875 }
 0x12d   :  { %v878_v63 = vpop.eup %877  ;;  %675 = vmatprep.mubr.f32.mxu1 %v876_v62 }
 0x12e   :  { %676 = vmatmul.mubr.f32.vlgmr.msra.gmra.mrb[0].mxu1 %v878_v63 }
 0x12f   :  { %840 = vmatpush3.bf16.msra.mxu1 %v837_v17 }
 0x130   :  { %v880_v0 = vpop.eup %879  ;;  %842 = vmatprep.subr.bf16.mxu1 %v841_v19 }
 0x131   :  { %v882_v1 = vpop.eup %881  ;;  %678 = vmatprep.mubr.f32.mxu1 %v880_v0  ;;  %v545_v0 = vld [vmem:[%s1102_s3 + $0x3] ss:$0 sm:$0xff]  ;;  %s957_s3 = scalar_lea.vmem %s525_s9, 512 }
 0x132   :  { %679 = vmatmul.mubr.f32.gmra.mrb[2].mxu1 %v882_v1  ;;  %p958_p10 = scmp.ne.s32.totalorder %s525_s9, %s957_s3  ;;  %p963_p12 = scmp.lt.s32.totalorder %s957_s3, %s957_s3 }
 0x133   :  { %844 = vmatpush3.bf16.msra.mxu1 %v841_v19 }
 0x134   :  { %846 = vmatprep.subr.bf16.mxu1 %v845_v22  ;;  %p964_p13 = por %p963_p12, %p962_p11 }
 0x136   :  { %p965_p0 = pnand %p964_p13, %p958_p10 }
 0x137   :  { %848 = vmatpush3.bf16.msra.mxu1 %v845_v22 }
 0x138   :  { %850 = vmatprep.subr.bf16.mxu1 %v849_v25 }
 0x13b   :  { %852 = vmatpush3.bf16.msra.mxu1 %v849_v25 }
 0x13c   :  { %854 = vmatprep.subr.bf16.mxu1 %v853_v28 }
 0x13f   :  { %856 = vmatpush3.bf16.msra.mxu1 %v853_v28 }
 0x140   :  { %858 = vmatprep.subr.bf16.mxu1 %v857_v31 }
 0x143   :  { %860 = vmatpush3.bf16.msra.mxu1 %v857_v31 }
 0x144   :  { %862 = vmatprep.subr.bf16.mxu1 %v861_v34 }
 0x147   :  { %864 = vmatpush3.bf16.msra.mxu1 %v861_v34 }
 0x148   :  { %866 = vmatprep.subr.bf16.mxu1 %v865_v50 }
 0x14b   :  { %868 = vmatpush3.bf16.msra.mxu1 %v865_v50 }
 0x201   :  { %v677_v36 = vpop.f32.mrb[0].mxu1 }
 0x202   :  { %v278_v37 = vadd.f32 %v677_v36, %v543_v35  ;;  %v272_v38 = vpop.f32.mrb[1].mxu1 }
 0x203   :  { %v273_v39 = vadd.f32 %v543_v35, %v272_v38 }
 0x205   :  { %883 = vtanh.f32 %v273_v39  ;;  %v680_v40 = vpop.f32.mrb[2].mxu1 }
 0x206   :  { %885 = vtanh.f32 %v278_v37  ;;  %v288_v41 = vadd.f32 %v680_v40, %v543_v35  ;;  %v282_v42 = vpop.f32.mrb[3].mxu1 }
 0x207   :  { %v283_v43 = vadd.f32 %v543_v35, %v282_v42 }
 0x209   :  { %887 = vtanh.f32 %v283_v43 }
 0x20a   :  { %889 = vtanh.f32 %v288_v41 }
 0x20f   :  { %v884_v44 = vpop.eup %883 }
 0x210   :  { %v886_v45 = vpop.eup %885  ;;  %713 = vmatprep.mubr.f32.mxu0 %v884_v44 }
 0x211   :  { %714 = vmatmul.mubr.f32.vlgmr.msra.gmra.mrb[4].mxu0 %v886_v45 }
 0x213   :  { %v888_v46 = vpop.eup %887 }
 0x214   :  { %v890_v47 = vpop.eup %889  ;;  %716 = vmatprep.mubr.f32.mxu0 %v888_v46 }
 0x215   :  { %717 = vmatmul.mubr.f32.gmra.mrb[6].mxu0 %v890_v47 }
 0x2e4   :  { %v715_v52 = vpop.f32.mrb[4].mxu0 }
 0x2e5   :  { %v388_v53 = vadd.f32 %v715_v52, %v544_v51  ;;  %v382_v54 = vpop.f32.mrb[5].mxu0 }
 0x2e6   :  { %v383_v55 = vadd.f32 %v544_v51, %v382_v54 }
 0x2e7   :  { %v402_v58 = vmax.f32 %v388_v53, 0.0 }
 0x2e8   :  { %v401_v56 = vmax.f32 %v383_v55, 0.0  ;;  %v718_v57 = vpop.f32.mrb[6].mxu0 }
 0x2e9   :  { %v398_v59 = vadd.f32 %v718_v57, %v544_v51  ;;  %v392_v60 = vpop.f32.mrb[7].mxu0 }
 0x2ea   :  { %v393_v61 = vadd.f32 %v544_v51, %v392_v60  ;;  %751 = vmatprep.mubr.f32.mxu1 %v401_v56 }
 0x2eb   :  { %752 = vmatmul.mubr.f32.vlgmr.msra.gmra.mrb[4].mxu1 %v402_v58  ;;  %v404_v63 = vmax.f32 %v398_v59, 0.0 }
 0x2ec   :  { %v403_v62 = vmax.f32 %v393_v61, 0.0 }
 0x2ee   :  { %754 = vmatprep.mubr.f32.mxu1 %v403_v62 }
 0x2ef   :  { %755 = vmatmul.mubr.f32.gmra.mrb[6].mxu1 %v404_v63 }
 0x3be   :  { %v753_v1 = vpop.f32.mrb[4].mxu1 }
 0x3bf   :  { %v498_v2 = vadd.f32 %v753_v1, %v545_v0  ;;  %v492_v3 = vpop.f32.mrb[5].mxu1 }
 0x3c0   :  { %v493_v4 = vadd.f32 %v545_v0, %v492_v3 }
 0x3c1   :  { %v512_v5 = vadd.f32 %v886_v45, %v498_v2 }
 0x3c2   :  { %v511_v6 = vadd.f32 %v884_v44, %v493_v4  ;;  %v756_v7 = vpop.f32.mrb[6].mxu1 }
 0x3c3   :  { %516 = vst [vmem:[#allocation8 + $0x8] sm:$0xff] %v512_v5  ;;  %v508_v8 = vadd.f32 %v756_v7, %v545_v0  ;;  %v502_v9 = vpop.f32.mrb[7].mxu1 }
 0x3c4   :  { %515 = vst [vmem:[#allocation8] sm:$0xff] %v511_v6  ;;  %v503_v10 = vadd.f32 %v545_v0, %v502_v9 }
 0x3c5   :  { %v514_v11 = vadd.f32 %v890_v47, %v508_v8 }
 0x3c6   :  { %v513_v12 = vadd.f32 %v888_v46, %v503_v10 }
 0x3c7   :  { %518 = vst [vmem:[#allocation8 + $0x18] sm:$0xff] %v514_v11 }
 0x3c8   :  { %517 = vst [vmem:[#allocation8 + $0x10] sm:$0xff] %v513_v12 }
 0x3c9   :  { %968 = shalt.err (!%p965_p0)
}
 0x3ca   :  { %s969_s12 = scalar_lea.hbm %s1103_s4, 512 }
 0x3cb   :  { %p970_p1 = scmp.ne.s32.totalorder %s1103_s4, %s969_s12  ;;  %p973_p2 = scmp.lt.u32.totalorder %s969_s12, %s1103_s4 }
 0x3cd   :  { %p975_p3 = pnand %p973_p2, %p970_p1 }
 0x3cf   :  { %978 = shalt.err (!%p975_p3)
}
 0x3d0   :  { %530 = dma.vmem_to_hbm [thread:$0]  %s525_s9, 512, %s1103_s4, [#allocation4], %s987_s27, %s987_s27, %s988_s28  }
 0x3d1   :  { %983 = dma.done.wait [#allocation4], 512  }
 0x3d2   :  { %984 = vsyncadd [#allocation4], 4294966784 }
 0x3d3   :  { %534 = vsyncpa [#allocation3], 1 }
 0x3d4   :  { %535 = vsyncpa [#allocation6], 1 }
 0x3d5   :  { %536 = vsyncpa [#allocation4], 1 }

</bundles_post_ra>
